<compile_context>
chip_gen: v5e
topology: v5e:2x2
jax: 0.10.0
libtpu: 0.0.40
codegen_flags: <defaults>
</compile_context>

<pallas_src>
import jax
import jax.numpy as jnp
from jax import lax
from jax.experimental import pallas as pl
from jax.experimental.pallas import tpu as pltpu


def neti_embed_kernel(ids_ref, tok_hbm, pos_ref, emb_ref, tok_buf, sems):
    """One grid step == one batch row.

    ids_ref : SMEM (B*S,) int32, already remapped so placeholder tokens point
              at the appended mapper-output rows of tok_hbm.
    tok_hbm : HBM (V+B, D) gather table (vocab rows + mapper rows).
    pos_ref : VMEM (S, D) position embeddings.
    emb_ref : VMEM (S, D) output block for this batch row.
    tok_buf : VMEM (2, S, D) double-buffered gathered rows.
    sems    : DMA semaphores, one per buffer slot.
    """
    b = pl.program_id(0)
    nb = pl.num_programs(0)
    S, D = pos_ref.shape

    def issue_rows(seq, slot):
        # One unconditional row DMA per token of sequence `seq` into slot.
        def body(s, carry):
            tok_id = ids_ref[seq * S + s]
            pltpu.make_async_copy(
                tok_hbm.at[pl.ds(tok_id, 1), :],
                tok_buf.at[slot, pl.ds(s, 1), :],
                sems.at[slot],
            ).start()
            return carry
        lax.fori_loop(0, S, body, 0)

    # Prologue: fill slot 0 with the first sequence on the first grid step.
    @pl.when(b == 0)
    def _():
        issue_rows(0, 0)

    # Prefetch the next sequence into the other slot; these DMAs overlap the
    # wait + add + store of the current slot below.
    @pl.when(b + 1 < nb)
    def _():
        issue_rows(b + 1, (b + 1) % 2)

    # Single wait covering all S row copies of the current slot (byte counts
    # add up to exactly one (S, D) transfer of the table dtype).
    slot = b % 2
    pltpu.make_async_copy(
        tok_hbm.at[pl.ds(0, S), :],
        tok_buf.at[slot],
        sems.at[slot],
    ).wait()

    # Position-embedding add; single lane-dense (S, D) store per grid step.
    emb_ref[...] = (tok_buf[slot] + pos_ref[...]).astype(emb_ref.dtype)


def neti_clip_text_embeddings(input_ids, placeholder_token_id, timesteps,
                              unet_layers, token_table, pos_table,
                              mapper_w, mapper_b, out_dtype=None):
    """Forward pass of NeTICLIPTextEmbeddings (batch path, output_bypass=True)."""
    B, S = input_ids.shape
    V, D = token_table.shape
    out_dtype = token_table.dtype if out_dtype is None else out_dtype

    # NeTI mapper stand-in: the real NeTIMapper is an external module set via
    # set_mapper(); its projection is tiny, so it lives in the wrapper.
    # TODO(synk): real NeTIMapper (pos-enc + MLP + truncation_idx) is external;
    # a deterministic linear stand-in of identical I/O shape is used here.
    mapper_in = jnp.stack([timesteps.astype(jnp.float32),
                           unet_layers.astype(jnp.float32)], axis=1)       # (B, 2)
    mfull = mapper_in @ mapper_w + mapper_b                                # (B, 2D)
    mapper_out = mfull[:, :D].astype(token_table.dtype)   # replaces placeholder
    bypass = mfull[:, D:]                                  # bypass_outputs

    # Fold the placeholder scatter-overwrite into the gather: append the B
    # mapper rows to the vocab table and redirect placeholder ids to them.
    table = jnp.concatenate([token_table, mapper_out], axis=0)             # (V+B, D)
    row_idx = jnp.arange(B, dtype=jnp.int32)[:, None]                      # (B, 1)
    ids = jnp.where(input_ids == placeholder_token_id,
                    jnp.int32(V) + row_idx,
                    input_ids.astype(jnp.int32))                           # (B, S)
    ids_flat = ids.reshape(-1)                                             # (B*S,)

    pos_slice = pos_table[:S]                                              # (S, D)

    grid_spec = pltpu.PrefetchScalarGridSpec(
        num_scalar_prefetch=1,               # ids_flat -> SMEM
        grid=(B,),
        in_specs=[
            pl.BlockSpec(memory_space=pl.ANY),                 # (V+B, D) table (HBM)
            pl.BlockSpec((S, D), lambda b, ids: (0, 0)),       # pos rows (VMEM)
        ],
        out_specs=pl.BlockSpec((None, S, D), lambda b, ids: (b, 0, 0)),
        scratch_shapes=[
            pltpu.VMEM((2, S, D), token_table.dtype),          # double-buffered rows
            pltpu.SemaphoreType.DMA((2,)),                     # one sem per slot
        ],
    )

    emb = pl.pallas_call(
        neti_embed_kernel,
        out_shape=jax.ShapeDtypeStruct((B, S, D), out_dtype),
        grid_spec=grid_spec,
        compiler_params=pltpu.CompilerParams(
            # Grid carries the double-buffer slot state -> must be arbitrary.
            dimension_semantics=("arbitrary",)),
    )(ids_flat, table, pos_slice)

    return emb, bypass


def reference(input_ids, placeholder_token_id, timesteps, unet_layers,
              token_table, pos_table, mapper_w, mapper_b):
    B, S = input_ids.shape
    V, D = token_table.shape
    tok = token_table[input_ids]                                           # (B, S, D)
    mapper_in = jnp.stack([timesteps.astype(jnp.float32),
                           unet_layers.astype(jnp.float32)], axis=1)
    mfull = mapper_in @ mapper_w + mapper_b
    mapper_out, bypass = mfull[:, :D], mfull[:, D:]
    mask = (input_ids == placeholder_token_id)[:, :, None]
    emb = jnp.where(mask, mapper_out[:, None, :], tok)
    emb = emb + pos_table[:S][None]
    return emb, bypass


if __name__ == "__main__":
    # Small synthetic config (CLIPTextConfig stand-in).
    B, S, D = 2, 8, 128           # batch, seq_len, hidden_size
    V, P = 64, 16                 # vocab_size, max_position_embeddings
    placeholder_token_id = 49

    key = jax.random.PRNGKey(0)
    k_tok, k_pos, k_ids, k_w, k_b, k_t, k_l = jax.random.split(key, 7)

    token_table = jax.random.normal(k_tok, (V, D), dtype=jnp.float32) * 0.02
    pos_table = jax.random.normal(k_pos, (P, D), dtype=jnp.float32) * 0.02
    mapper_w = jax.random.normal(k_w, (2, 2 * D), dtype=jnp.float32) * 0.02
    mapper_b = jax.random.normal(k_b, (2 * D,), dtype=jnp.float32) * 0.02

    # Random ids below the placeholder id, then exactly one placeholder per row
    # (matches the PyTorch scatter assumption).
    input_ids = jax.random.randint(k_ids, (B, S), 0, placeholder_token_id,
                                   dtype=jnp.int32)
    input_ids = input_ids.at[0, 3].set(placeholder_token_id)
    input_ids = input_ids.at[1, 5].set(placeholder_token_id)

    timesteps = jax.random.randint(k_t, (B,), 0, 1000, dtype=jnp.int32)
    unet_layers = jax.random.randint(k_l, (B,), 0, 16, dtype=jnp.int32)

    emb, bypass = neti_clip_text_embeddings(
        input_ids, placeholder_token_id, timesteps, unet_layers,
        token_table, pos_table, mapper_w, mapper_b)
    jax.block_until_ready((emb, bypass))

    emb_ref, bypass_ref = reference(
        input_ids, placeholder_token_id, timesteps, unet_layers,
        token_table, pos_table, mapper_w, mapper_b)

    assert emb.shape == (B, S, D) and bypass.shape == (B, D)
    assert jnp.allclose(emb, emb_ref, atol=1e-5, rtol=1e-5)
    assert jnp.allclose(bypass, bypass_ref, atol=1e-5, rtol=1e-5)
    print("KERNEL_OK")
</pallas_src>

<mosaic_0001>
module attributes {stable_mosaic.version = 11 : i64} {
  func.func @neti_embed_kernel(%arg0: i32, %arg1: memref<16xi32, #tpu.memory_space<smem>>, %arg2: memref<66x128xf32, #tpu.memory_space<any>>, %arg3: memref<8x128xf32, #tpu.memory_space<vmem>>, %arg4: memref<1x8x128xf32, #tpu.memory_space<vmem>>, %arg5: memref<2x8x128xf32, #tpu.memory_space<vmem>>, %arg6: memref<2x!tpu.dma_semaphore, #tpu.memory_space<semaphore_mem>>) attributes {dimension_semantics = [#tpu.dimension_semantics<arbitrary>], iteration_bounds = array<i64: 2>, scalar_prefetch = 1 : i64, scratch_operands = 2 : i64, tpu.core_type = #tpu.core_type<tc>, window_params = [{}, {pipeline_mode = #tpu.pipeline_mode<synchronous>, transform_indices = @transform_1, window_bounds = array<i64: 8, 128>}, {transform_indices = @transform_2, window_bounds = array<i64: 1, 8, 128>}]} {
    %c0_i32 = arith.constant 0 : i32
    %0 = arith.cmpi eq, %arg0, %c0_i32 : i32
    %1 = arith.extui %0 : i1 to i32
    %c0_i32_0 = arith.constant 0 : i32
    %2 = arith.cmpi ne, %1, %c0_i32_0 : i32
    scf.if %2 {
      %c0_i32_18 = arith.constant 0 : i32
      %c8_i32 = arith.constant 8 : i32
      %30 = arith.addi %c0_i32_18, %c8_i32 : i32
      %c1_i32_19 = arith.constant 1 : i32
      scf.for %arg7 = %c0_i32_18 to %30 step %c1_i32_19  : i32 {
        %c0_i32_21 = arith.constant 0 : i32
        %31 = arith.addi %c0_i32_21, %arg7 : i32
        %32 = arith.index_cast %31 : i32 to index
        %33 = memref.load %arg1[%32] : memref<16xi32, #tpu.memory_space<smem>>
        %c0_i32_22 = arith.constant 0 : i32
        %c0_i32_23 = arith.constant 0 : i32
        %c0_i32_24 = arith.constant 0 : i32
        %34 = tpu.memref_slice %arg2[%33, %c0_i32_24] : memref<66x128xf32, #tpu.memory_space<any>> -> memref<1x128xf32, #tpu.memory_space<any>>
        %c0_i32_25 = arith.constant 0 : i32
        %35 = tpu.memref_slice %arg5[%c0_i32_22, %arg7, %c0_i32_25] : memref<2x8x128xf32, #tpu.memory_space<vmem>> -> memref<1x1x128xf32, #tpu.memory_space<vmem>>
        %36 = tpu.memref_squeeze %35 : memref<1x1x128xf32, #tpu.memory_space<vmem>> -> memref<1x128xf32, #tpu.memory_space<vmem>>
        %37 = tpu.memref_slice %arg6[%c0_i32_23] : memref<2x!tpu.dma_semaphore, #tpu.memory_space<semaphore_mem>> -> memref<1x!tpu.dma_semaphore, #tpu.memory_space<semaphore_mem>>
        %38 = tpu.memref_squeeze %37 : memref<1x!tpu.dma_semaphore, #tpu.memory_space<semaphore_mem>> -> memref<!tpu.dma_semaphore, #tpu.memory_space<semaphore_mem>>
        tpu.enqueue_dma source(%34 : memref<1x128xf32, #tpu.memory_space<any>>) target(%36 : memref<1x128xf32, #tpu.memory_space<vmem>>) target_semaphore(%38 : memref<!tpu.dma_semaphore, #tpu.memory_space<semaphore_mem>>)
      }
      %c8_i32_20 = arith.constant 8 : i32
    } else {
    }
    %c1_i32 = arith.constant 1 : i32
    %3 = arith.addi %arg0, %c1_i32 : i32
    %c2_i32 = arith.constant 2 : i32
    %4 = arith.cmpi slt, %3, %c2_i32 : i32
    %5 = arith.extui %4 : i1 to i32
    %c0_i32_1 = arith.constant 0 : i32
    %6 = arith.cmpi ne, %5, %c0_i32_1 : i32
    scf.if %6 {
      %c1_i32_18 = arith.constant 1 : i32
      %30 = arith.addi %arg0, %c1_i32_18 : i32
      %c1_i32_19 = arith.constant 1 : i32
      %31 = arith.addi %arg0, %c1_i32_19 : i32
      %c2_i32_20 = arith.constant 2 : i32
      %c0_i32_21 = arith.constant 0 : i32
      %32 = arith.cmpi eq, %c2_i32_20, %c0_i32_21 : i32
      %c1_i32_22 = arith.constant 1 : i32
      %33 = arith.select %32, %c1_i32_22, %c2_i32_20 : i32
      %34 = arith.remsi %31, %33 : i32
      %c0_i32_23 = arith.constant 0 : i32
      %35 = arith.cmpi ne, %34, %c0_i32_23 : i32
      %c0_i32_24 = arith.constant 0 : i32
      %36 = arith.cmpi slt, %34, %c0_i32_24 : i32
      %c0_i32_25 = arith.constant 0 : i32
      %37 = arith.cmpi slt, %33, %c0_i32_25 : i32
      %38 = arith.xori %36, %37 : i1
      %39 = arith.andi %38, %35 : i1
      %40 = arith.addi %34, %33 : i32
      %41 = arith.select %39, %40, %34 : i32
      %c0_i32_26 = arith.constant 0 : i32
      %c8_i32 = arith.constant 8 : i32
      %42 = arith.addi %c0_i32_26, %c8_i32 : i32
      %c1_i32_27 = arith.constant 1 : i32
      scf.for %arg7 = %c0_i32_26 to %42 step %c1_i32_27  : i32 {
        %c8_i32_29 = arith.constant 8 : i32
        %43 = arith.muli %30, %c8_i32_29 : i32
        %44 = arith.addi %43, %arg7 : i32
        %45 = arith.index_cast %44 : i32 to index
        %46 = memref.load %arg1[%45] : memref<16xi32, #tpu.memory_space<smem>>
        %c0_i32_30 = arith.constant 0 : i32
        %47 = tpu.memref_slice %arg2[%46, %c0_i32_30] : memref<66x128xf32, #tpu.memory_space<any>> -> memref<1x128xf32, #tpu.memory_space<any>>
        %c0_i32_31 = arith.constant 0 : i32
        %48 = tpu.memref_slice %arg5[%41, %arg7, %c0_i32_31] : memref<2x8x128xf32, #tpu.memory_space<vmem>> -> memref<1x1x128xf32, #tpu.memory_space<vmem>>
        %49 = tpu.memref_squeeze %48 : memref<1x1x128xf32, #tpu.memory_space<vmem>> -> memref<1x128xf32, #tpu.memory_space<vmem>>
        %50 = tpu.memref_slice %arg6[%41] : memref<2x!tpu.dma_semaphore, #tpu.memory_space<semaphore_mem>> -> memref<1x!tpu.dma_semaphore, #tpu.memory_space<semaphore_mem>>
        %51 = tpu.memref_squeeze %50 : memref<1x!tpu.dma_semaphore, #tpu.memory_space<semaphore_mem>> -> memref<!tpu.dma_semaphore, #tpu.memory_space<semaphore_mem>>
        tpu.enqueue_dma source(%47 : memref<1x128xf32, #tpu.memory_space<any>>) target(%49 : memref<1x128xf32, #tpu.memory_space<vmem>>) target_semaphore(%51 : memref<!tpu.dma_semaphore, #tpu.memory_space<semaphore_mem>>)
      }
      %c8_i32_28 = arith.constant 8 : i32
    } else {
    }
    %c2_i32_2 = arith.constant 2 : i32
    %c0_i32_3 = arith.constant 0 : i32
    %7 = arith.cmpi eq, %c2_i32_2, %c0_i32_3 : i32
    %c1_i32_4 = arith.constant 1 : i32
    %8 = arith.select %7, %c1_i32_4, %c2_i32_2 : i32
    %9 = arith.remsi %arg0, %8 : i32
    %c0_i32_5 = arith.constant 0 : i32
    %10 = arith.cmpi ne, %9, %c0_i32_5 : i32
    %c0_i32_6 = arith.constant 0 : i32
    %11 = arith.cmpi slt, %9, %c0_i32_6 : i32
    %c0_i32_7 = arith.constant 0 : i32
    %12 = arith.cmpi slt, %8, %c0_i32_7 : i32
    %13 = arith.xori %11, %12 : i1
    %14 = arith.andi %13, %10 : i1
    %15 = arith.addi %9, %8 : i32
    %16 = arith.select %14, %15, %9 : i32
    %c0_i32_8 = arith.constant 0 : i32
    %c0_i32_9 = arith.constant 0 : i32
    %17 = tpu.memref_slice %arg2[%c0_i32_8, %c0_i32_9] : memref<66x128xf32, #tpu.memory_space<any>> -> memref<8x128xf32, #tpu.memory_space<any>>
    %c0_i32_10 = arith.constant 0 : i32
    %c0_i32_11 = arith.constant 0 : i32
    %18 = tpu.memref_slice %arg5[%16, %c0_i32_10, %c0_i32_11] : memref<2x8x128xf32, #tpu.memory_space<vmem>> -> memref<1x8x128xf32, #tpu.memory_space<vmem>>
    %19 = tpu.memref_squeeze %18 : memref<1x8x128xf32, #tpu.memory_space<vmem>> -> memref<8x128xf32, #tpu.memory_space<vmem>>
    %20 = tpu.memref_slice %arg6[%16] : memref<2x!tpu.dma_semaphore, #tpu.memory_space<semaphore_mem>> -> memref<1x!tpu.dma_semaphore, #tpu.memory_space<semaphore_mem>>
    %21 = tpu.memref_squeeze %20 : memref<1x!tpu.dma_semaphore, #tpu.memory_space<semaphore_mem>> -> memref<!tpu.dma_semaphore, #tpu.memory_space<semaphore_mem>>
    tpu.wait_dma2 semaphore(%21 : memref<!tpu.dma_semaphore, #tpu.memory_space<semaphore_mem>>) src(%17 : memref<8x128xf32, #tpu.memory_space<any>>) dst(%19 : memref<8x128xf32, #tpu.memory_space<vmem>>)
    %22 = arith.index_cast %16 : i32 to index
    %c0 = arith.constant 0 : index
    %c0_12 = arith.constant 0 : index
    %23 = vector.load %arg5[%22, %c0, %c0_12] : memref<2x8x128xf32, #tpu.memory_space<vmem>>, vector<1x8x128xf32>
    %24 = vector.shape_cast %23 : vector<1x8x128xf32> to vector<8x128xf32>
    %c0_13 = arith.constant 0 : index
    %c0_14 = arith.constant 0 : index
    %25 = vector.load %arg3[%c0_13, %c0_14] : memref<8x128xf32, #tpu.memory_space<vmem>>, vector<8x128xf32>
    %26 = arith.addf %24, %25 : vector<8x128xf32>
    %c0_15 = arith.constant 0 : index
    %c0_16 = arith.constant 0 : index
    %c0_17 = arith.constant 0 : index
    %27 = vector.load %arg4[%c0_15, %c0_16, %c0_17] : memref<1x8x128xf32, #tpu.memory_space<vmem>>, vector<1x8x128xf32>
    %28 = vector.shape_cast %27 : vector<1x8x128xf32> to vector<8x128xf32>
    %29 = vector.shape_cast %26 : vector<8x128xf32> to vector<1x8x128xf32>
    tpu.vector_store %arg4[%c0_15, %c0_16, %c0_17], %29 {strides = array<i32>} : memref<1x8x128xf32, #tpu.memory_space<vmem>>, vector<1x8x128xf32>,
    return
  }
  func.func @transform_1(%arg0: i32, %arg1: memref<16xi32, #tpu.memory_space<smem>>) -> (i32, i32) {
    %c0_i32 = arith.constant 0 : i32
    %c0_i32_0 = arith.constant 0 : i32
    %c0_i32_1 = arith.constant 0 : i32
    return %c0_i32, %c0_i32_0 : i32, i32
  }
  func.func @transform_2(%arg0: i32, %arg1: memref<16xi32, #tpu.memory_space<smem>>) -> (i32, i32, i32) {
    %c0_i32 = arith.constant 0 : i32
    %c0_i32_0 = arith.constant 0 : i32
    %c0_i32_1 = arith.constant 0 : i32
    return %arg0, %c0_i32, %c0_i32_0 : i32, i32, i32
  }
}

</mosaic_0001>

<bundles_post_ra>
// kernel: tpu_custom_call.1
= control target key start
LH: loop header
LB: loop body
LE: loop exit
PB: predicated region body
PF: predicated region fallthrough
CT: control target
= control target key end

     0   :  { %s590_s15 = smov [#allocation5]   ;;  %s765_s0 = inlined_call_operand.hbm [shape: s32[16], index: 0, kind: input, shape index: {}]   ;;  %s766_s1 = inlined_call_operand.hbm [shape: f32[66,128], index: 1, kind: input, shape index: {}]   ;;  %s767_s2 = inlined_call_operand.hbm [shape: f32[8,128], index: 2, kind: input, shape index: {}]   ;;  %s768_s3 = inlined_call_operand.hbm [shape: f32[2,8,128], index: 3, kind: output, shape index: {}]  }
   0x1   :  { %s9_s14 = sshll.u32 %s765_s0, 4  ;;  %s10_s14 = int_to_ptr.hbm [resolvable:$true] %s9_s14 }
   0x2   :  { %12 = dma.hbm_to_smem %s10_s14, 16, %s590_s15, [#allocation4] }
   0x3   :  { %554 = dma.done.wait [#allocation4], 16 }
   0x4   :  { %555 = vsyncadd [#allocation4], 4294967280 }
   0x5   :  { %15 = sfence }
   0x6   :  { %16 = vsyncpa [#allocation7], 0 }
   0x7   :  { %17 = vsyncpa [#allocation8], 0 }
   0x8   :  { %19 = vsyncpa [#allocation8 + $0x1], 0  ;;  %s617_s16 = smov 0   ;;  %s619_s17 = smov 0  }
   0x9   :  { %s621_s18 = smov 0   ;;  %s623_s19 = smov 0  }
   0xa LB: > { %s638_s0 = sadd.s32 4294967295, %s580_s19   ;;  %s320_s20 = sadd.s32 4294967294, %s580_s19   ;;  %s580_s19 = sphi %s623_s19, %s776_s19   ;;  %s576_s18 = sphi %s621_s18, %s775_s18   ;;  %s572_s17 = sphi %s619_s17, %s774_s17   ;;  %s568_s16 = sphi %s617_s16, %s773_s16  }
   0xb   : > { %s642_s21 = sadd.s32 1, %s580_s19   ;;  %s53_s22 = sadd.s32 1, %s576_s18 }
   0xc   : > { %s50_s23 = ssub.s32 %s580_s19, %s642_s21  ;;  %p63_p0 = scmp.ne.s32.totalorder %s576_s18, %s572_s17 }
   0xd   : > { %p51_p1 = scmp.eq.s32.totalorder %s50_s23, 0  ;;  %p64_p2 = scmp.eq.s32.totalorder %s638_s0, 1 }
   0xe   : > { %p69_p3 = scmp.ne.s32.totalorder %s572_s17, %s568_s16  ;;  %p70_p4 = scmp.eq.s32.totalorder %s320_s20, 1 }
   0xf   : > { %s653_s24 = scalar_select %p51_p1, %s576_s18, %s53_s22  }
  0x10   : > { %p655_p5 = por %p64_p2, %p63_p0  ;;  %p659_p6 = por %p70_p4, %p69_p3 }
  0x11   : > { %p321_p7 = scmp.ge.s32.totalorder %s580_s19, 1  ;;  %p77_p8 = scmp.lt.s32.totalorder %s580_s19, 3 }
  0x12   : > { %p322_p9 = scmp.ne.s32.totalorder %s638_s0, 0  ;;  %p359_p10 = scmp.eq.s32.totalorder %s638_s0, 0 }
  0x13   : > { %p78_p11 = pnand %p321_p7, %p77_p8  ;;  %s89_s29 = sshll.u32 %s767_s2, 4  ;;  %s90_s29 = int_to_ptr.hbm [resolvable:$true] %s89_s29 }
  0x14   : > { %s591_s30 = smov [#allocation6]  }
  0x15   : > { %p351_p12 = pneg %p78_p11  ;;  %s91_s4 = sshll.u32 %s591_s30, 4  ;;  %s92_s4 = int_to_ptr.vmem [resolvable:$true] %s91_s4 }
  0x16   : > { %104 = sbr.rel (%p78_p11) target bundleno = 146 (0x92), region = 24 }
  0x17   : > { %p352_p13 = pnand %p359_p10, %p351_p12 }
  0x19   : > { %354 = dma.hbm_to_vmem [thread:$0]  (!%p352_p13), %s90_s29, 128, %s92_s4, [#allocation7]  }
  0x1b   : > { %557 = dma.done.wait (%p359_p10), [#allocation7], 128  }
  0x1c   : > { %559 = vsyncadd (%p359_p10), [#allocation7], 4294967168  ;;  %s769_s5 = sand.u32 1, %s572_s17   ;;  %123 = sbr.rel (%p322_p9) target bundleno = 69 (0x45), region = 32 }
  0x1d   : > { %s673_s6 = sshll.u32 %s769_s5, 3  ;;  %s678_s8 = smov (!%p322_p9), 0  }
  0x1e   : > { %s119_s7 = scalar_lea.vmem [#allocation9], %s673_s6 }
  0x21 LB: >> { %s130_s9 = sld [smem:[#allocation5 + %s584_s8]]  ;;  %s132_s10 = scalar_lea.vmem [#allocation2], %s584_s8  ;;  %s584_s8 = sphi %s678_s8, %s129_s8  }
  0x22   : >> { %s142_s11 = sshll.u32 %s132_s10, 4  ;;  %s458_s28 = scalar_lea.hbm %s766_s1, 72  ;;  %s143_s11 = int_to_ptr.vmem [resolvable:$true] %s142_s11 }
  0x27   : >> { %s131_s14 = scalar_lea.hbm %s766_s1, %s130_s9 }
  0x28   : >> { %s140_s15 = sshll.u32 %s131_s14, 4  ;;  %s141_s15 = int_to_ptr.hbm [resolvable:$true] %s140_s15 }
  0x29   : >> { %s454_s20 = sshra.s32 %s141_s15, 4  ;;  %s455_s20 = int_to_ptr.hbm [resolvable:$true] %s454_s20 }
  0x2a   : >> { %s456_s22 = scalar_lea.hbm %s455_s20, 1  ;;  %p459_p1 = scmp.lt.s32.totalorder %s455_s20, %s766_s1 }
  0x2b   : >> { %p457_p0 = scmp.ne.s32.totalorder %s455_s20, %s456_s22  ;;  %p460_p2 = scmp.lt.s32.totalorder %s458_s28, %s456_s22 }
  0x2d   : >> { %p461_p3 = por %p460_p2, %p459_p1 }
  0x2f   : >> { %p462_p4 = pnand %p461_p3, %p457_p0 }
  0x31   : >> { %465 = shalt.err (!%p462_p4)  }
  0x32   : >> { %s466_s4 = sshra.s32 %s143_s11, 4  ;;  %s592_s10 = smov [#allocation2]   ;;  %s467_s4 = int_to_ptr.vmem [resolvable:$true] %s466_s4 }
  0x33   : >> { %s468_s9 = scalar_lea.vmem %s467_s4, 1  ;;  %s470_s12 = scalar_lea.vmem %s592_s10, 16 }
  0x34   : >> { %p469_p7 = scmp.ne.s32.totalorder %s467_s4, %s468_s9  ;;  %p471_p8 = scmp.lt.s32.totalorder %s467_s4, [#allocation2] }
  0x35   : >> { %p472_p9 = scmp.lt.s32.totalorder %s470_s12, %s468_s9 }
  0x37   : >> { %p473_p10 = por %p472_p9, %p471_p8 }
  0x39   : >> { %p474_p11 = pnand %p473_p10, %p469_p7 }
  0x3b   : >> { %477 = shalt.err (!%p474_p11)  }
  0x3c   : >> { %145 = dma.hbm_to_vmem [thread:$0]  %s141_s15, 16, %s143_s11, [#allocation3] }
  0x3d   : >> { %s129_s8 = sadd.s32 1, %s584_s8  }
  0x3e   : >> { %p126_p12 = scmp.ge.s32.totalorder %s129_s8, 8  }
  0x40   : > { %128 = sbr.rel (!%p126_p12) target bundleno = 33 (0x21), region = 99 }
  0x45 PF: > { %s146_s13 = sadd.s32 1, %s638_s0 }
  0x46   : > { %p327_p13 = scmp.ge.s32.totalorder %s146_s13, 2 }
  0x47   : > { %p151_p0 = scmp.lt.s32.totalorder (!%p327_p13), %s146_s13, 0  ;;  %s152_s14 = ssub.s32 (!%p327_p13), 0, %s146_s13 }
  0x48   : > { %150 = sbr.rel (%p327_p13) target bundleno = 120 (0x78), region = 47  ;;  %s328_s20 = smin.u32 (!%p327_p13), %s152_s14, %s146_s13 }
  0x49   : > { %s154_s22 = sand.u32 (!%p327_p13), 1, %s328_s20   ;;  %s700_s11 = smov (!%p327_p13), 0  }
  0x4a   : > { %s155_s23 = ssub.s32 (!%p327_p13), 0, %s154_s22 }
  0x4d   : > { %s778_s23 = smov (!%p151_p0, %s155_s23), %s154_s22 }
  0x4e   : > { %p330_p1 = scmp.lt.s32.totalorder %s778_s23, 0  ;;  %s161_s27 = sadd.s32 2, %s778_s23 }
  0x50   : > { %s780_s27 = smov (!%p330_p1, %s161_s27), %s778_s23 }
  0x51 LB: >> { %s343_s8 = sshll.u32 %s638_s0, 3  ;;  %s332_s29 = sshll.u32 %s780_s27, 3  ;;  %s588_s11 = sphi %s700_s11, %s168_s11  }
  0x52   : >> { %s344_s15 = sadd.s32 8, %s343_s8  ;;  %s174_s4 = sadd.s32 %s588_s11, %s332_s29 }
  0x53   : >> { %s170_s28 = sadd.s32 %s588_s11, %s344_s15  ;;  %s175_s9 = scalar_lea.vmem [#allocation2], %s174_s4 }
  0x54   : >> { %s171_s30 = sld [smem:[#allocation5 + %s170_s28]]  ;;  %s709_s10 = sshll.u32 %s175_s9, 4  ;;  %s187_s10 = int_to_ptr.vmem [resolvable:$true] %s709_s10 }
  0x55   : >> { %s176_s22 = scalar_lea.sflag [#allocation3], %s780_s27  ;;  %s482_s28 = scalar_lea.hbm %s766_s1, 72 }
  0x5a   : >> { %s172_s14 = scalar_lea.hbm %s766_s1, %s171_s30 }
  0x5b   : >> { %s184_s20 = sshll.u32 %s172_s14, 4  ;;  %s185_s20 = int_to_ptr.hbm [resolvable:$true] %s184_s20 }
  0x5c   : >> { %s478_s23 = sshra.s32 %s185_s20, 4  ;;  %s479_s23 = int_to_ptr.hbm [resolvable:$true] %s478_s23 }
  0x5d   : >> { %s480_s5 = scalar_lea.hbm %s479_s23, 1  ;;  %p483_p3 = scmp.lt.s32.totalorder %s479_s23, %s766_s1 }
  0x5e   : >> { %p481_p2 = scmp.ne.s32.totalorder %s479_s23, %s480_s5  ;;  %p484_p4 = scmp.lt.s32.totalorder %s482_s28, %s480_s5 }
  0x60   : >> { %p485_p7 = por %p484_p4, %p483_p3 }
  0x62   : >> { %p486_p8 = pnand %p485_p7, %p481_p2 }
  0x64   : >> { %489 = shalt.err (!%p486_p8)  }
  0x65   : >> { %s490_s30 = sshra.s32 %s187_s10, 4  ;;  %s593_s12 = smov [#allocation2]   ;;  %s491_s30 = int_to_ptr.vmem [resolvable:$true] %s490_s30 }
  0x66   : >> { %s492_s9 = scalar_lea.vmem %s491_s30, 1  ;;  %s494_s13 = scalar_lea.vmem %s593_s12, 16 }
  0x67   : >> { %p493_p9 = scmp.ne.s32.totalorder %s491_s30, %s492_s9  ;;  %p495_p10 = scmp.lt.s32.totalorder %s491_s30, [#allocation2] }
  0x68   : >> { %p496_p11 = scmp.lt.s32.totalorder %s494_s13, %s492_s9 }
  0x6a   : >> { %p497_p12 = por %p496_p11, %p495_p10 }
  0x6c   : >> { %p498_p13 = pnand %p497_p12, %p493_p9 }
  0x6e   : >> { %501 = shalt.err (!%p498_p13)  }
  0x6f   : >> { %189 = dma.hbm_to_vmem [thread:$0]  %s185_s20, 16, %s187_s10, %s176_s22 }
  0x70   : >> { %s168_s11 = sadd.s32 1, %s588_s11  }
  0x71   : >> { %p165_p0 = scmp.ge.s32.totalorder %s168_s11, 8  }
  0x73   : > { %167 = sbr.rel (!%p165_p0) target bundleno = 81 (0x51), region = 110 }
  0x78 PF: > { %p190_p1 = scmp.lt.s32.totalorder %s638_s0, 0  ;;  %s191_s5 = ssub.s32 0, %s638_s0 }
  0x79   : > { %s333_s14 = smin.u32 %s638_s0, %s191_s5 }
  0x7a   : > { %s193_s23 = sand.u32 1, %s333_s14  }
  0x7b   : > { %s194_s8 = ssub.s32 0, %s193_s23 }
  0x7c   : > { %s782_s8 = smov (!%p190_p1, %s194_s8), %s193_s23 }
  0x7d   : > { %p335_p2 = scmp.lt.s32.totalorder %s782_s8, 0  ;;  %s200_s15 = sadd.s32 2, %s782_s8 }
  0x7f   : > { %s784_s15 = smov (!%p335_p2, %s200_s15), %s782_s8 }
  0x80   : > { %s336_s10 = sshll.u32 %s784_s15, 3  ;;  %s204_s22 = scalar_lea.sflag [#allocation3], %s784_s15 }
  0x81   : > { %s203_s20 = scalar_lea.vmem [#allocation2], %s336_s10 }
  0x82   : > { %560 = dma.done.wait %s204_s22, 128 }
  0x83   : > { %561 = vsyncadd %s204_s22, 4294967168  ;;  %s338_s27 = sshll.u32 %s638_s0, 3  ;;  %s225_s4 = sshll.u32 %s119_s7, 4  ;;  %v208_v0 = vld [vmem:[%s203_s20] sm:$0xff]  ;;  %v209_v1 = vld [vmem:[#allocation6] sm:$0xff]  ;;  %s226_s4 = int_to_ptr.vmem [resolvable:$true] %s225_s4 }
  0x84   : > { %s223_s29 = scalar_lea.hbm %s768_s3, %s338_s27  ;;  %v210_v2 = vadd.f32 %v209_v1, %v208_v0  ;;  %s772_s9 = sand.u32 1, %s572_s17  }
  0x85   : > { %s227_s30 = sshll.u32 %s223_s29, 4  ;;  %s213_s12 = scalar_lea.sflag [#allocation8], %s772_s9  ;;  %s228_s30 = int_to_ptr.hbm [resolvable:$true] %s227_s30 }
  0x86   : > { %211 = vst [vmem:[%s119_s7] sm:$0xff] %v210_v2  ;;  %s516_s13 = sshra.s32 %s228_s30, 4  ;;  %s522_s23 = scalar_lea.hbm %s768_s3, 16  ;;  %s517_s13 = int_to_ptr.hbm [resolvable:$true] %s516_s13 }
  0x87   : > { %s518_s5 = scalar_lea.hbm %s517_s13, 8  ;;  %p523_p8 = scmp.lt.s32.totalorder %s517_s13, %s768_s3 }
  0x88   : > { %p519_p3 = scmp.ne.s32.totalorder %s517_s13, %s518_s5  ;;  %p524_p9 = scmp.lt.s32.totalorder %s522_s23, %s518_s5 }
  0x8a   : > { %p520_p4 = pnand %p519_p3, %p655_p5  ;;  %p525_p10 = por %p524_p9, %p523_p8 }
  0x8c   : > { %p521_p7 = pneg %p520_p4 }
  0x8e   : > { %p526_p11 = pnand %p525_p10, %p521_p7 }
  0x90   : > { %529 = shalt.err (!%p526_p11)
}
  0x91   : > { %349 = dma.vmem_to_hbm [thread:$0]  (%p655_p5), %s226_s4, 128, %s228_s30, %s213_s12  }
  0x92 PF: > { %p361_p12 = scmp.ge.s32.totalorder %s580_s19, 2  ;;  %s239_s6 = sand.u32 1, %s568_s16  }
  0x93   : > { %s240_s7 = scalar_lea.sflag [#allocation8], %s239_s6 }
  0x94   : > { %p356_p13 = pnand %p361_p12, %p659_p6 }
  0x96   : > { %p357_p0 = pneg %p356_p13 }
  0x98   : > { %563 = dma.done.wait (%p357_p0), %s240_s7, 128  }
  0x99   : > { %565 = vsyncadd (%p357_p0), %s240_s7, 4294967168  ;;  %p22_p1 = scmp.ge.s32.totalorder %s642_s21, 4   ;;  %s773_s16 = smov %s572_s17 }
  0x9a   : > { %s774_s17 = smov %s576_s18  ;;  %s775_s18 = smov %s653_s24 }
  0x9b   : > { %s776_s19 = smov %s642_s21  ;;  %24 = sbr.rel (!%p22_p1) target bundleno = 10 (0xa), region = 121 }
  0xa0   :  { %246 = vsyncpa [#allocation7], 1 }
  0xa1   :  { %248 = vsyncpa [#allocation7 + $0x1], 1 }
  0xa2   :  { %249 = vsyncpa [#allocation8], 1 }
  0xa3   :  { %251 = vsyncpa [#allocation8 + $0x1], 1 }
  0xa4   :  { %252 = vsyncmov [#allocation3] }
  0xa7   :  { %s253_s19 = vpop.sfrf %252 }
  0xa8   :  { %p341_p5 = scmp.ne.s32.totalorder %s253_s19, 0 }
  0xaa   :  { %257 = shalt.err (%p341_p5)  }
  0xab   :  { %259 = vsyncmov [#allocation3 + $0x1] }
  0xae   :  { %s260_s25 = vpop.sfrf %259 }
  0xaf   :  { %p342_p6 = scmp.ne.s32.totalorder %s260_s25, 0 }
  0xb1   :  { %264 = shalt.err (%p342_p6)  }

</bundles_post_ra>
